<compile_context>
chip_gen: v7x
topology: tpu7x:2x2x1
jax: 0.10.0
libtpu: 0.0.40
codegen_flags: <defaults>
</compile_context>

<pallas_src>
import numpy as np
import jax
import jax.numpy as jnp
from jax.experimental import pallas as pl
from jax.experimental.pallas import tpu as pltpu

HEAD_NUM = 4
HEAD_DIM = 16
NEWS_DIM = HEAD_NUM * HEAD_DIM      # 64
ATT_HIDDEN = 32
BATCH = 2
HIST_LEN = 8                        # N (number of clicked news)


# -----------------------------------------------------------------------------
# Kernel factory: one grid step == one batch tile of TB rows (M = TB*N tokens).
# -----------------------------------------------------------------------------
def _make_user_encoder_kernel(tb, n, d, h_att):
    m = tb * n
    inv_sqrt_hd = 1.0 / float(np.sqrt(HEAD_DIM))

    def kernel(x_ref, bd_mask_ref, pool_mask_ref, head_sel_ref,
               wqkv_ref, bqkv_ref, w1_ref, b1_ref, w2_ref, b2_ref,
               out_ref):
        # ---- fused QKV projection: single [M, D] x [D, 3D] matmul (bf16 -> f32) ----
        x2d = x_ref[...]                                                   # [M, D] bf16
        qkv = jnp.dot(x2d, wqkv_ref[...],
                      preferred_element_type=jnp.float32) + bqkv_ref[...]  # [M, 3D] f32
        q = qkv[:, 0:d]                  # 64-lane aligned slices
        k = qkv[:, d:2 * d]
        v = qkv[:, 2 * d:3 * d]
        kt = k.T                                                           # [D, M] (one XLU transpose)

        bd_mask = bd_mask_ref[...]                                         # [M, M]
        sel = head_sel_ref[...]                                            # [HEAD_NUM, D]

        # ---- multi-head attention: full-width matmuls, no lane slicing/concat ----
        ctx = jnp.zeros((m, d), jnp.float32)
        for h in range(HEAD_NUM):                                          # static unroll (4)
            sel_h = sel[h:h + 1, :]                                        # [1, D] 0/1 lane mask
            # (q ⊙ sel_h) @ k^T == q_h @ k_h^T  (other heads' lanes contribute 0)
            s = jnp.dot(q * sel_h, kt,
                        preferred_element_type=jnp.float32) * inv_sqrt_hd  # [M, M]
            ew = jnp.exp(s) * bd_mask                                      # key mask + block-diag
            denom = jnp.sum(ew, axis=-1, keepdims=True) + 1e-8
            attn = ew * pl.reciprocal(denom, approx=True)
            # attn @ (v ⊙ sel_h) only touches head-h output lanes -> accumulate in place
            ctx = ctx + jnp.dot(attn, v * sel_h,
                                preferred_element_type=jnp.float32)        # [M, D]

        # ---- additive attention pooling over the history axis ----
        e = jnp.tanh(jnp.dot(ctx.astype(jnp.bfloat16), w1_ref[...],
                             preferred_element_type=jnp.float32) + b1_ref[...])   # [M, H]
        logit = jnp.sum(e * w2_ref[...], axis=-1, keepdims=True) + b2_ref[...]    # [M, 1]
        alpha = jnp.exp(logit) * pool_mask_ref[...]                                # [M, 1]

        alpha3 = alpha.reshape(tb, n, 1)
        ctx3 = ctx.reshape(tb, n, d)
        pden = jnp.sum(alpha3, axis=1, keepdims=True) + 1e-8                       # [TB,1,1]
        alpha3 = alpha3 * pl.reciprocal(pden, approx=True)
        out_ref[...] = jnp.sum(ctx3 * alpha3, axis=1)                              # [TB, D]

    return kernel


# -----------------------------------------------------------------------------
# Wrapper: batch-tile grid, fused/pre-shaped operands, lane-dense 2-D slabs.
# -----------------------------------------------------------------------------
def user_encoder(clicked_news, clicked_mask, params, batch_tile=None):
    B, N, D = clicked_news.shape
    H = params["w1"].shape[1]
    if clicked_mask is None:
        clicked_mask = jnp.ones((B, N), jnp.float32)
    clicked_mask = clicked_mask.astype(jnp.float32)

    # Batch tiling: small B -> one grid step; large B -> tiles of 16 rows
    # (multiple "parallel" steps so both v7x TensorCores get work).
    TB = batch_tile if batch_tile is not None else (B if B <= 16 else 16)
    num_tiles = -(-B // TB)
    B_pad = num_tiles * TB
    if B_pad != B:
        pad = B_pad - B
        clicked_news = jnp.pad(clicked_news, ((0, pad), (0, 0), (0, 0)))
        clicked_mask = jnp.pad(clicked_mask, ((0, pad), (0, 0)))
    M = TB * N

    # Pre-flattened, lane/sublane-dense operands (no in-kernel input reshapes).
    x2d = clicked_news.reshape(B_pad * N, D).astype(jnp.bfloat16)               # [T*M, D]
    block_diag = jnp.repeat(jnp.repeat(jnp.eye(TB, dtype=jnp.float32), N, axis=0),
                            N, axis=1)                                          # [M, M]
    bd_mask = (block_diag[None, :, :] *
               clicked_mask.reshape(num_tiles, 1, M)).reshape(num_tiles * M, M)  # [T*M, M]
    pool_mask = clicked_mask.reshape(num_tiles * M, 1)                           # [T*M, 1]
    head_sel = jnp.repeat(jnp.eye(HEAD_NUM, dtype=jnp.float32), HEAD_DIM, axis=1)  # [Hn, D]

    # Fused QKV weight/bias; bf16 weights + activations for the MXU fast path.
    wqkv = jnp.concatenate([params["wq"], params["wk"], params["wv"]], axis=1).astype(jnp.bfloat16)
    bqkv = jnp.concatenate([params["bq"], params["bk"], params["bv"]], axis=1).astype(jnp.float32)
    w1 = params["w1"].astype(jnp.bfloat16)
    b1 = params["b1"].astype(jnp.float32)
    w2_row = params["w2"].reshape(1, H).astype(jnp.float32)   # row form for VPU reduce
    b2 = params["b2"].reshape(1, 1).astype(jnp.float32)

    def full(shape):
        return pl.BlockSpec(shape, lambda t: (0,) * len(shape))

    grid_spec = pltpu.PrefetchScalarGridSpec(
        num_scalar_prefetch=0,
        grid=(num_tiles,),
        in_specs=[
            pl.BlockSpec((M, D), lambda t: (t, 0)),          # token slab (bf16)
            pl.BlockSpec((M, M), lambda t: (t, 0)),          # block-diag key mask
            pl.BlockSpec((M, 1), lambda t: (t, 0)),          # pooling mask
            full((HEAD_NUM, D)),                             # head lane selectors
            full((D, 3 * D)), full((1, 3 * D)),              # fused Wqkv, bqkv
            full((D, H)), full((1, H)),                      # att fc1
            full((1, H)), full((1, 1)),                      # att fc2 row + bias
        ],
        out_specs=pl.BlockSpec((TB, D), lambda t: (t, 0)),   # lane/sublane-dense slab
    )

    out = pl.pallas_call(
        _make_user_encoder_kernel(TB, N, D, H),
        out_shape=jax.ShapeDtypeStruct((B_pad, D), jnp.float32),
        grid_spec=grid_spec,
        compiler_params=pltpu.CompilerParams(dimension_semantics=("parallel",)),
    )(x2d, bd_mask, pool_mask, head_sel, wqkv, bqkv, w1, b1, w2_row, b2)
    return out[:B]


# -----------------------------------------------------------------------------
# Pure-JAX f32 reference (mirrors the PyTorch forward) for correctness.
# -----------------------------------------------------------------------------
def user_encoder_ref(x, mask, p):
    B, N, D = x.shape
    q = x @ p["wq"] + p["bq"]
    k = x @ p["wk"] + p["bk"]
    v = x @ p["wv"] + p["bv"]

    def split(t):
        return t.reshape(B, N, HEAD_NUM, HEAD_DIM).transpose(0, 2, 1, 3)

    qh, kh, vh = split(q), split(k), split(v)
    scores = jnp.einsum("bhqd,bhkd->bhqk", qh, kh) / np.sqrt(HEAD_DIM)
    scores = jnp.exp(scores) * mask[:, None, None, :]
    attn = scores / (scores.sum(-1, keepdims=True) + 1e-8)
    ctx = jnp.einsum("bhqk,bhkd->bhqd", attn, vh).transpose(0, 2, 1, 3).reshape(B, N, D)

    e = jnp.tanh(ctx @ p["w1"] + p["b1"])
    alpha = jnp.exp(e @ p["w2"] + p["b2"]) * mask[:, :, None]
    alpha = alpha / (alpha.sum(1, keepdims=True) + 1e-8)
    return (ctx * alpha).sum(1)


if __name__ == "__main__":
    key = jax.random.PRNGKey(0)
    ks = jax.random.split(key, 12)

    D, H = NEWS_DIM, ATT_HIDDEN
    scale = 0.05
    params = {
        "wq": jax.random.normal(ks[0], (D, D), jnp.float32) * scale,
        "bq": jax.random.normal(ks[1], (1, D), jnp.float32) * scale,
        "wk": jax.random.normal(ks[2], (D, D), jnp.float32) * scale,
        "bk": jax.random.normal(ks[3], (1, D), jnp.float32) * scale,
        "wv": jax.random.normal(ks[4], (D, D), jnp.float32) * scale,
        "bv": jax.random.normal(ks[5], (1, D), jnp.float32) * scale,
        "w1": jax.random.normal(ks[6], (D, H), jnp.float32) * scale,
        "b1": jax.random.normal(ks[7], (1, H), jnp.float32) * scale,
        "w2": jax.random.normal(ks[8], (H, 1), jnp.float32) * scale,
        "b2": jax.random.normal(ks[9], (1, 1), jnp.float32) * scale,
    }

    clicked_news = jax.random.normal(ks[10], (BATCH, HIST_LEN, D), jnp.float32)
    # History lengths [8, 5] -> padded tail masked out for batch element 1.
    lengths = jnp.array([8, 5], jnp.int32)
    clicked_mask = (jnp.arange(HIST_LEN)[None, :] < lengths[:, None]).astype(jnp.float32)

    out = user_encoder(clicked_news, clicked_mask, params)
    out = jax.block_until_ready(out)

    ref = user_encoder_ref(clicked_news, clicked_mask, params)
    # Tolerance accounts for bf16 matmul inputs + approx reciprocal (f32 reference).
    np.testing.assert_allclose(np.asarray(out), np.asarray(ref), rtol=2e-2, atol=2e-2)

    print("KERNEL_OK")
</pallas_src>

<mosaic_0001>
module attributes {stable_mosaic.version = 11 : i64} {
  func.func @kernel(%arg0: i32, %arg1: memref<16x64xbf16, #tpu.memory_space<vmem>>, %arg2: memref<16x16xf32, #tpu.memory_space<vmem>>, %arg3: memref<16x1xf32, #tpu.memory_space<vmem>>, %arg4: memref<4x64xf32, #tpu.memory_space<vmem>>, %arg5: memref<64x192xbf16, #tpu.memory_space<vmem>>, %arg6: memref<1x192xf32, #tpu.memory_space<vmem>>, %arg7: memref<64x32xbf16, #tpu.memory_space<vmem>>, %arg8: memref<1x32xf32, #tpu.memory_space<vmem>>, %arg9: memref<1x32xf32, #tpu.memory_space<vmem>>, %arg10: memref<1x1xf32, #tpu.memory_space<vmem>>, %arg11: memref<2x64xf32, #tpu.memory_space<vmem>>) attributes {dimension_semantics = [#tpu.dimension_semantics<parallel>], iteration_bounds = array<i64: 1>, scalar_prefetch = 0 : i64, scratch_operands = 0 : i64, tpu.core_type = #tpu.core_type<tc>, window_params = [{transform_indices = @transform_0, window_bounds = array<i64: 16, 64>}, {transform_indices = @transform_1, window_bounds = array<i64: 16, 16>}, {transform_indices = @transform_2, window_bounds = array<i64: 16, 1>}, {pipeline_mode = #tpu.pipeline_mode<synchronous>, transform_indices = @transform_3, window_bounds = array<i64: 4, 64>}, {pipeline_mode = #tpu.pipeline_mode<synchronous>, transform_indices = @transform_4, window_bounds = array<i64: 64, 192>}, {pipeline_mode = #tpu.pipeline_mode<synchronous>, transform_indices = @transform_5, window_bounds = array<i64: 1, 192>}, {pipeline_mode = #tpu.pipeline_mode<synchronous>, transform_indices = @transform_6, window_bounds = array<i64: 64, 32>}, {pipeline_mode = #tpu.pipeline_mode<synchronous>, transform_indices = @transform_7, window_bounds = array<i64: 1, 32>}, {pipeline_mode = #tpu.pipeline_mode<synchronous>, transform_indices = @transform_8, window_bounds = array<i64: 1, 32>}, {pipeline_mode = #tpu.pipeline_mode<synchronous>, transform_indices = @transform_9, window_bounds = array<i64: 1, 1>}, {transform_indices = @transform_10, window_bounds = array<i64: 2, 64>}]} {
    %c0 = arith.constant 0 : index
    %c0_0 = arith.constant 0 : index
    %0 = vector.load %arg1[%c0, %c0_0] : memref<16x64xbf16, #tpu.memory_space<vmem>>, vector<16x64xbf16>
    %c0_1 = arith.constant 0 : index
    %c0_2 = arith.constant 0 : index
    %1 = vector.load %arg5[%c0_1, %c0_2] : memref<64x192xbf16, #tpu.memory_space<vmem>>, vector<64x192xbf16>
    %cst = arith.constant dense<0.000000e+00> : vector<16x192xf32>
    %2 = tpu.matmul %0, %1, %cst {dimension_numbers = #tpu.dot_dimension_numbers<[1], [0], [0], [1], [0, 0, 1, 1], [], []>} : vector<16x64xbf16>, vector<64x192xbf16>, vector<16x192xf32> -> vector<16x192xf32>
    %c0_3 = arith.constant 0 : index
    %c0_4 = arith.constant 0 : index
    %3 = vector.load %arg6[%c0_3, %c0_4] : memref<1x192xf32, #tpu.memory_space<vmem>>, vector<1x192xf32>
    %4 = vector.broadcast %3 : vector<1x192xf32> to vector<16x192xf32>
    %5 = arith.addf %2, %4 : vector<16x192xf32>
    %6 = vector.extract_strided_slice %5 {offsets = [0, 0], sizes = [16, 64], strides = [1, 1]} : vector<16x192xf32> to vector<16x64xf32>
    %7 = vector.extract_strided_slice %5 {offsets = [0, 64], sizes = [16, 64], strides = [1, 1]} : vector<16x192xf32> to vector<16x64xf32>
    %8 = vector.extract_strided_slice %5 {offsets = [0, 128], sizes = [16, 64], strides = [1, 1]} : vector<16x192xf32> to vector<16x64xf32>
    %9 = tpu.transpose %7, [1, 0] : vector<16x64xf32> -> vector<64x16xf32>
    %c0_5 = arith.constant 0 : index
    %c0_6 = arith.constant 0 : index
    %10 = vector.load %arg2[%c0_5, %c0_6] : memref<16x16xf32, #tpu.memory_space<vmem>>, vector<16x16xf32>
    %c0_7 = arith.constant 0 : index
    %c0_8 = arith.constant 0 : index
    %11 = vector.load %arg4[%c0_7, %c0_8] : memref<4x64xf32, #tpu.memory_space<vmem>>, vector<4x64xf32>
    %cst_9 = arith.constant 0.000000e+00 : f32
    %12 = vector.broadcast %cst_9 : f32 to vector<16x64xf32>
    %13 = vector.extract_strided_slice %11 {offsets = [0, 0], sizes = [1, 64], strides = [1, 1]} : vector<4x64xf32> to vector<1x64xf32>
    %14 = vector.broadcast %13 : vector<1x64xf32> to vector<16x64xf32>
    %15 = arith.mulf %6, %14 : vector<16x64xf32>
    %cst_10 = arith.constant dense<0.000000e+00> : vector<16x16xf32>
    %16 = tpu.matmul %15, %9, %cst_10 {dimension_numbers = #tpu.dot_dimension_numbers<[1], [0], [0], [1], [0, 0, 1, 1], [], []>} : vector<16x64xf32>, vector<64x16xf32>, vector<16x16xf32> -> vector<16x16xf32>
    %cst_11 = arith.constant 2.500000e-01 : f32
    %17 = vector.broadcast %cst_11 : f32 to vector<16x16xf32>
    %18 = arith.mulf %16, %17 : vector<16x16xf32>
    %19 = math.exp %18 : vector<16x16xf32>
    %20 = arith.mulf %19, %10 : vector<16x16xf32>
    %cst_12 = arith.constant dense<0.000000e+00> : vector<16xf32>
    %21 = vector.multi_reduction <add>, %20, %cst_12 [1] : vector<16x16xf32> to vector<16xf32>
    %22 = vector.shape_cast %21 : vector<16xf32> to vector<16x1xf32>
    %cst_13 = arith.constant 9.99999993E-9 : f32
    %23 = vector.broadcast %cst_13 : f32 to vector<16x1xf32>
    %24 = arith.addf %22, %23 : vector<16x1xf32>
    %25 = tpu.reciprocal %24 {approx = true} : vector<16x1xf32> -> vector<16x1xf32>
    %26 = vector.broadcast %25 : vector<16x1xf32> to vector<16x16xf32>
    %27 = arith.mulf %20, %26 : vector<16x16xf32>
    %28 = vector.broadcast %13 : vector<1x64xf32> to vector<16x64xf32>
    %29 = arith.mulf %8, %28 : vector<16x64xf32>
    %cst_14 = arith.constant dense<0.000000e+00> : vector<16x64xf32>
    %30 = tpu.matmul %27, %29, %cst_14 {dimension_numbers = #tpu.dot_dimension_numbers<[1], [0], [0], [1], [0, 0, 1, 1], [], []>} : vector<16x16xf32>, vector<16x64xf32>, vector<16x64xf32> -> vector<16x64xf32>
    %31 = arith.addf %12, %30 : vector<16x64xf32>
    %32 = vector.extract_strided_slice %11 {offsets = [1, 0], sizes = [1, 64], strides = [1, 1]} : vector<4x64xf32> to vector<1x64xf32>
    %33 = vector.broadcast %32 : vector<1x64xf32> to vector<16x64xf32>
    %34 = arith.mulf %6, %33 : vector<16x64xf32>
    %cst_15 = arith.constant dense<0.000000e+00> : vector<16x16xf32>
    %35 = tpu.matmul %34, %9, %cst_15 {dimension_numbers = #tpu.dot_dimension_numbers<[1], [0], [0], [1], [0, 0, 1, 1], [], []>} : vector<16x64xf32>, vector<64x16xf32>, vector<16x16xf32> -> vector<16x16xf32>
    %cst_16 = arith.constant 2.500000e-01 : f32
    %36 = vector.broadcast %cst_16 : f32 to vector<16x16xf32>
    %37 = arith.mulf %35, %36 : vector<16x16xf32>
    %38 = math.exp %37 : vector<16x16xf32>
    %39 = arith.mulf %38, %10 : vector<16x16xf32>
    %cst_17 = arith.constant dense<0.000000e+00> : vector<16xf32>
    %40 = vector.multi_reduction <add>, %39, %cst_17 [1] : vector<16x16xf32> to vector<16xf32>
    %41 = vector.shape_cast %40 : vector<16xf32> to vector<16x1xf32>
    %cst_18 = arith.constant 9.99999993E-9 : f32
    %42 = vector.broadcast %cst_18 : f32 to vector<16x1xf32>
    %43 = arith.addf %41, %42 : vector<16x1xf32>
    %44 = tpu.reciprocal %43 {approx = true} : vector<16x1xf32> -> vector<16x1xf32>
    %45 = vector.broadcast %44 : vector<16x1xf32> to vector<16x16xf32>
    %46 = arith.mulf %39, %45 : vector<16x16xf32>
    %47 = vector.broadcast %32 : vector<1x64xf32> to vector<16x64xf32>
    %48 = arith.mulf %8, %47 : vector<16x64xf32>
    %cst_19 = arith.constant dense<0.000000e+00> : vector<16x64xf32>
    %49 = tpu.matmul %46, %48, %cst_19 {dimension_numbers = #tpu.dot_dimension_numbers<[1], [0], [0], [1], [0, 0, 1, 1], [], []>} : vector<16x16xf32>, vector<16x64xf32>, vector<16x64xf32> -> vector<16x64xf32>
    %50 = arith.addf %31, %49 : vector<16x64xf32>
    %51 = vector.extract_strided_slice %11 {offsets = [2, 0], sizes = [1, 64], strides = [1, 1]} : vector<4x64xf32> to vector<1x64xf32>
    %52 = vector.broadcast %51 : vector<1x64xf32> to vector<16x64xf32>
    %53 = arith.mulf %6, %52 : vector<16x64xf32>
    %cst_20 = arith.constant dense<0.000000e+00> : vector<16x16xf32>
    %54 = tpu.matmul %53, %9, %cst_20 {dimension_numbers = #tpu.dot_dimension_numbers<[1], [0], [0], [1], [0, 0, 1, 1], [], []>} : vector<16x64xf32>, vector<64x16xf32>, vector<16x16xf32> -> vector<16x16xf32>
    %cst_21 = arith.constant 2.500000e-01 : f32
    %55 = vector.broadcast %cst_21 : f32 to vector<16x16xf32>
    %56 = arith.mulf %54, %55 : vector<16x16xf32>
    %57 = math.exp %56 : vector<16x16xf32>
    %58 = arith.mulf %57, %10 : vector<16x16xf32>
    %cst_22 = arith.constant dense<0.000000e+00> : vector<16xf32>
    %59 = vector.multi_reduction <add>, %58, %cst_22 [1] : vector<16x16xf32> to vector<16xf32>
    %60 = vector.shape_cast %59 : vector<16xf32> to vector<16x1xf32>
    %cst_23 = arith.constant 9.99999993E-9 : f32
    %61 = vector.broadcast %cst_23 : f32 to vector<16x1xf32>
    %62 = arith.addf %60, %61 : vector<16x1xf32>
    %63 = tpu.reciprocal %62 {approx = true} : vector<16x1xf32> -> vector<16x1xf32>
    %64 = vector.broadcast %63 : vector<16x1xf32> to vector<16x16xf32>
    %65 = arith.mulf %58, %64 : vector<16x16xf32>
    %66 = vector.broadcast %51 : vector<1x64xf32> to vector<16x64xf32>
    %67 = arith.mulf %8, %66 : vector<16x64xf32>
    %cst_24 = arith.constant dense<0.000000e+00> : vector<16x64xf32>
    %68 = tpu.matmul %65, %67, %cst_24 {dimension_numbers = #tpu.dot_dimension_numbers<[1], [0], [0], [1], [0, 0, 1, 1], [], []>} : vector<16x16xf32>, vector<16x64xf32>, vector<16x64xf32> -> vector<16x64xf32>
    %69 = arith.addf %50, %68 : vector<16x64xf32>
    %70 = vector.extract_strided_slice %11 {offsets = [3, 0], sizes = [1, 64], strides = [1, 1]} : vector<4x64xf32> to vector<1x64xf32>
    %71 = vector.broadcast %70 : vector<1x64xf32> to vector<16x64xf32>
    %72 = arith.mulf %6, %71 : vector<16x64xf32>
    %cst_25 = arith.constant dense<0.000000e+00> : vector<16x16xf32>
    %73 = tpu.matmul %72, %9, %cst_25 {dimension_numbers = #tpu.dot_dimension_numbers<[1], [0], [0], [1], [0, 0, 1, 1], [], []>} : vector<16x64xf32>, vector<64x16xf32>, vector<16x16xf32> -> vector<16x16xf32>
    %cst_26 = arith.constant 2.500000e-01 : f32
    %74 = vector.broadcast %cst_26 : f32 to vector<16x16xf32>
    %75 = arith.mulf %73, %74 : vector<16x16xf32>
    %76 = math.exp %75 : vector<16x16xf32>
    %77 = arith.mulf %76, %10 : vector<16x16xf32>
    %cst_27 = arith.constant dense<0.000000e+00> : vector<16xf32>
    %78 = vector.multi_reduction <add>, %77, %cst_27 [1] : vector<16x16xf32> to vector<16xf32>
    %79 = vector.shape_cast %78 : vector<16xf32> to vector<16x1xf32>
    %cst_28 = arith.constant 9.99999993E-9 : f32
    %80 = vector.broadcast %cst_28 : f32 to vector<16x1xf32>
    %81 = arith.addf %79, %80 : vector<16x1xf32>
    %82 = tpu.reciprocal %81 {approx = true} : vector<16x1xf32> -> vector<16x1xf32>
    %83 = vector.broadcast %82 : vector<16x1xf32> to vector<16x16xf32>
    %84 = arith.mulf %77, %83 : vector<16x16xf32>
    %85 = vector.broadcast %70 : vector<1x64xf32> to vector<16x64xf32>
    %86 = arith.mulf %8, %85 : vector<16x64xf32>
    %cst_29 = arith.constant dense<0.000000e+00> : vector<16x64xf32>
    %87 = tpu.matmul %84, %86, %cst_29 {dimension_numbers = #tpu.dot_dimension_numbers<[1], [0], [0], [1], [0, 0, 1, 1], [], []>} : vector<16x16xf32>, vector<16x64xf32>, vector<16x64xf32> -> vector<16x64xf32>
    %88 = arith.addf %69, %87 : vector<16x64xf32>
    %89 = arith.truncf %88 : vector<16x64xf32> to vector<16x64xbf16>
    %c0_30 = arith.constant 0 : index
    %c0_31 = arith.constant 0 : index
    %90 = vector.load %arg7[%c0_30, %c0_31] : memref<64x32xbf16, #tpu.memory_space<vmem>>, vector<64x32xbf16>
    %cst_32 = arith.constant dense<0.000000e+00> : vector<16x32xf32>
    %91 = tpu.matmul %89, %90, %cst_32 {dimension_numbers = #tpu.dot_dimension_numbers<[1], [0], [0], [1], [0, 0, 1, 1], [], []>} : vector<16x64xbf16>, vector<64x32xbf16>, vector<16x32xf32> -> vector<16x32xf32>
    %c0_33 = arith.constant 0 : index
    %c0_34 = arith.constant 0 : index
    %92 = vector.load %arg8[%c0_33, %c0_34] : memref<1x32xf32, #tpu.memory_space<vmem>>, vector<1x32xf32>
    %93 = vector.broadcast %92 : vector<1x32xf32> to vector<16x32xf32>
    %94 = arith.addf %91, %93 : vector<16x32xf32>
    %95 = math.tanh %94 : vector<16x32xf32>
    %c0_35 = arith.constant 0 : index
    %c0_36 = arith.constant 0 : index
    %96 = vector.load %arg9[%c0_35, %c0_36] : memref<1x32xf32, #tpu.memory_space<vmem>>, vector<1x32xf32>
    %97 = vector.broadcast %96 : vector<1x32xf32> to vector<16x32xf32>
    %98 = arith.mulf %95, %97 : vector<16x32xf32>
    %cst_37 = arith.constant dense<0.000000e+00> : vector<16xf32>
    %99 = vector.multi_reduction <add>, %98, %cst_37 [1] : vector<16x32xf32> to vector<16xf32>
    %100 = vector.shape_cast %99 : vector<16xf32> to vector<16x1xf32>
    %c0_38 = arith.constant 0 : index
    %c0_39 = arith.constant 0 : index
    %101 = vector.load %arg10[%c0_38, %c0_39] : memref<1x1xf32, #tpu.memory_space<vmem>>, vector<1x1xf32>
    %102 = vector.broadcast %101 : vector<1x1xf32> to vector<16x1xf32>
    %103 = arith.addf %100, %102 : vector<16x1xf32>
    %104 = math.exp %103 : vector<16x1xf32>
    %c0_40 = arith.constant 0 : index
    %c0_41 = arith.constant 0 : index
    %105 = vector.load %arg3[%c0_40, %c0_41] : memref<16x1xf32, #tpu.memory_space<vmem>>, vector<16x1xf32>
    %106 = arith.mulf %104, %105 : vector<16x1xf32>
    %107 = vector.shape_cast %106 : vector<16x1xf32> to vector<2x8x1xf32>
    %108 = vector.shape_cast %88 : vector<16x64xf32> to vector<2x8x64xf32>
    %cst_42 = arith.constant dense<0.000000e+00> : vector<2x1xf32>
    %109 = vector.multi_reduction <add>, %107, %cst_42 [1] : vector<2x8x1xf32> to vector<2x1xf32>
    %110 = vector.shape_cast %109 : vector<2x1xf32> to vector<2x1x1xf32>
    %cst_43 = arith.constant 9.99999993E-9 : f32
    %111 = vector.broadcast %cst_43 : f32 to vector<2x1x1xf32>
    %112 = arith.addf %110, %111 : vector<2x1x1xf32>
    %113 = tpu.reciprocal %112 {approx = true} : vector<2x1x1xf32> -> vector<2x1x1xf32>
    %114 = vector.broadcast %113 : vector<2x1x1xf32> to vector<2x8x1xf32>
    %115 = arith.mulf %107, %114 : vector<2x8x1xf32>
    %116 = vector.broadcast %115 : vector<2x8x1xf32> to vector<2x8x64xf32>
    %117 = arith.mulf %108, %116 : vector<2x8x64xf32>
    %cst_44 = arith.constant dense<0.000000e+00> : vector<2x64xf32>
    %118 = vector.multi_reduction <add>, %117, %cst_44 [1] : vector<2x8x64xf32> to vector<2x64xf32>
    %c0_45 = arith.constant 0 : index
    %c0_46 = arith.constant 0 : index
    %119 = vector.load %arg11[%c0_45, %c0_46] : memref<2x64xf32, #tpu.memory_space<vmem>>, vector<2x64xf32>
    tpu.vector_store %arg11[%c0_45, %c0_46], %118 {strides = array<i32>} : memref<2x64xf32, #tpu.memory_space<vmem>>, vector<2x64xf32>,
    return
  }
  func.func @transform_0(%arg0: i32) -> (i32, i32) {
    %c0_i32 = arith.constant 0 : i32
    %c0_i32_0 = arith.constant 0 : i32
    return %arg0, %c0_i32 : i32, i32
  }
  func.func @transform_1(%arg0: i32) -> (i32, i32) {
    %c0_i32 = arith.constant 0 : i32
    %c0_i32_0 = arith.constant 0 : i32
    return %arg0, %c0_i32 : i32, i32
  }
  func.func @transform_2(%arg0: i32) -> (i32, i32) {
    %c0_i32 = arith.constant 0 : i32
    %c0_i32_0 = arith.constant 0 : i32
    return %arg0, %c0_i32 : i32, i32
  }
  func.func @transform_3(%arg0: i32) -> (i32, i32) {
    %c0_i32 = arith.constant 0 : i32
    %c0_i32_0 = arith.constant 0 : i32
    %c0_i32_1 = arith.constant 0 : i32
    return %c0_i32, %c0_i32_0 : i32, i32
  }
  func.func @transform_4(%arg0: i32) -> (i32, i32) {
    %c0_i32 = arith.constant 0 : i32
    %c0_i32_0 = arith.constant 0 : i32
    %c0_i32_1 = arith.constant 0 : i32
    return %c0_i32, %c0_i32_0 : i32, i32
  }
  func.func @transform_5(%arg0: i32) -> (i32, i32) {
    %c0_i32 = arith.constant 0 : i32
    %c0_i32_0 = arith.constant 0 : i32
    %c0_i32_1 = arith.constant 0 : i32
    return %c0_i32, %c0_i32_0 : i32, i32
  }
  func.func @transform_6(%arg0: i32) -> (i32, i32) {
    %c0_i32 = arith.constant 0 : i32
    %c0_i32_0 = arith.constant 0 : i32
    %c0_i32_1 = arith.constant 0 : i32
    return %c0_i32, %c0_i32_0 : i32, i32
  }
  func.func @transform_7(%arg0: i32) -> (i32, i32) {
    %c0_i32 = arith.constant 0 : i32
    %c0_i32_0 = arith.constant 0 : i32
    %c0_i32_1 = arith.constant 0 : i32
    return %c0_i32, %c0_i32_0 : i32, i32
  }
  func.func @transform_8(%arg0: i32) -> (i32, i32) {
    %c0_i32 = arith.constant 0 : i32
    %c0_i32_0 = arith.constant 0 : i32
    %c0_i32_1 = arith.constant 0 : i32
    return %c0_i32, %c0_i32_0 : i32, i32
  }
  func.func @transform_9(%arg0: i32) -> (i32, i32) {
    %c0_i32 = arith.constant 0 : i32
    %c0_i32_0 = arith.constant 0 : i32
    %c0_i32_1 = arith.constant 0 : i32
    return %c0_i32, %c0_i32_0 : i32, i32
  }
  func.func @transform_10(%arg0: i32) -> (i32, i32) {
    %c0_i32 = arith.constant 0 : i32
    %c0_i32_0 = arith.constant 0 : i32
    return %arg0, %c0_i32 : i32, i32
  }
}

</mosaic_0001>

<bundles_post_ra>
// kernel: tpu_custom_call.1
= control target key start
LH: loop header
LB: loop body
LE: loop exit
PB: predicated region body
PF: predicated region fallthrough
CT: control target
= control target key end

     0   :  { %s1756_s0 = inlined_call_operand.hbm [shape: bf16[16,64], index: 0, kind: input, shape index: {}]   ;;  %s1757_s1 = inlined_call_operand.hbm [shape: f32[16,16], index: 1, kind: input, shape index: {}]   ;;  %s1758_s2 = inlined_call_operand.vmem [shape: f32[16,1], index: 2, kind: input, shape index: {}]   ;;  %s1759_s3 = inlined_call_operand.vmem [shape: f32[4,64], index: 3, kind: input, shape index: {}]   ;;  %s1760_s4 = inlined_call_operand.vmem [shape: bf16[64,192], index: 4, kind: input, shape index: {}]   ;;  %s1761_s5 = inlined_call_operand.vmem [shape: f32[1,192], index: 5, kind: input, shape index: {}]   ;;  %s1762_s6 = inlined_call_operand.vmem [shape: bf16[64,32], index: 6, kind: input, shape index: {}]   ;;  %s1763_s7 = inlined_call_operand.vmem [shape: f32[1,32], index: 7, kind: input, shape index: {}]   ;;  %s1764_s8 = inlined_call_operand.vmem [shape: f32[1,32], index: 8, kind: input, shape index: {}]   ;;  %s1765_s9 = inlined_call_operand.<no memory space> [shape: f32[1,1], index: 9, kind: input, shape index: {}]   ;;  %s1766_s10 = inlined_call_operand.hbm [shape: f32[2,64], index: 10, kind: output, shape index: {}]  }
   0x1   :  { %v15_v0 = vstv %s1765_s9 }
   0x2   :  { %16 = vst [vmem:[#allocation2] sm:$0x1] %v15_v0 }
   0x3   :  { %17 = vsyncpa [#allocation4], 0 }
   0x4   :  { %18 = vsyncpa [#allocation7], 0 }
   0x5   :  { %19 = vsyncpa [#allocation5], 0  ;;  %s1491_s15 = smov [#allocation3]   ;;  %s1419_s19 = scalar_lea.hbm %s1756_s0, 128 }
   0x6   :  { %s25_s16 = sshll.u32 %s1491_s15, 4  ;;  %p1420_p0 = scmp.ne.s32.totalorder %s1756_s0, %s1419_s19  ;;  %s26_s16 = int_to_ptr.vmem [resolvable:$true] %s25_s16 }
   0x7   :  { %p1423_p1 = scmp.lt.u32.totalorder %s1419_s19, %s1756_s0 }
   0x9   :  { %p1425_p2 = pnand %p1423_p1, %p1420_p0 }
   0xb   :  { %1428 = shalt.err (!%p1425_p2)
}
   0xc   :  { %s1429_s9 = scalar_lea.vmem %s26_s16, 128  ;;  %p1434_p4 = scmp.lt.s32.totalorder %s26_s16, %s26_s16 }
   0xd   :  { %p1430_p3 = scmp.ne.s32.totalorder %s26_s16, %s1429_s9  ;;  %p1435_p5 = scmp.lt.s32.totalorder %s1429_s9, %s1429_s9 }
   0xf   :  { %p1436_p6 = por %p1435_p5, %p1434_p4 }
  0x11   :  { %p1437_p7 = pnand %p1436_p6, %p1430_p3 }
  0x13   :  { %1440 = shalt.err (!%p1437_p7)
}
  0x14   :  { %s1492_s24 = smov 64   ;;  %s1493_s25 = smov 4  }
  0x15   :  { %31 = dma.hbm_to_vmem [thread:$0]  %s1756_s0, 128, %s26_s16, [#allocation4], %s1492_s24, %s1492_s24, %s1493_s25  }
  0x16   :  { %s1494_s28 = smov [#allocation6]   ;;  %s1441_s12 = scalar_lea.hbm %s1757_s1, 256 }
  0x17   :  { %s37_s29 = sshll.u32 %s1494_s28, 4  ;;  %p1442_p8 = scmp.ne.s32.totalorder %s1757_s1, %s1441_s12  ;;  %s38_s29 = int_to_ptr.vmem [resolvable:$true] %s37_s29 }
  0x18   :  { %p1445_p9 = scmp.lt.u32.totalorder %s1441_s12, %s1757_s1 }
  0x1a   :  { %p1447_p10 = pnand %p1445_p9, %p1442_p8 }
  0x1c   :  { %1450 = shalt.err (!%p1447_p10)
}
  0x1d   :  { %s1451_s18 = scalar_lea.vmem %s38_s29, 256  ;;  %p1456_p12 = scmp.lt.s32.totalorder %s38_s29, %s38_s29 }
  0x1e   :  { %p1452_p11 = scmp.ne.s32.totalorder %s38_s29, %s1451_s18  ;;  %p1457_p13 = scmp.lt.s32.totalorder %s1451_s18, %s1451_s18 }
  0x20   :  { %p1458_p0 = por %p1457_p13, %p1456_p12 }
  0x22   :  { %p1459_p1 = pnand %p1458_p0, %p1452_p11 }
  0x24   :  { %1462 = shalt.err (!%p1459_p1)
}
  0x25   :  { %s1495_s0 = smov 128   ;;  %s1496_s16 = smov 8  }
  0x26   :  { %43 = dma.hbm_to_vmem [thread:$0]  %s1757_s1, 256, %s38_s29, [#allocation7], %s1495_s0, %s1495_s0, %s1496_s16  }
  0x27   :  { %1485 = dma.done.wait [#allocation4], 128  }
  0x28   :  { %1486 = vsyncadd [#allocation4], 4294967168 }
  0x29   :  { %1487 = dma.done.wait [#allocation7], 256  }
  0x2a   :  { %1488 = vsyncadd [#allocation7], 4294967040  ;;  %v1497_v1 = vmov 0   ;;  %v1358_v2 = vld [vmem:[%s1760_s4 + $0x4] ss:$8 sps:$4 sm:$0xff]   ;;  %vm134_vm0 = vcmask 523264   ;;  %v79_v11 = vlaneseq }
  0x2b   :  { %170 = vmatprep.mubr.bf16.mxu0 %v1497_v1  ;;  %1356 = vset.pattern.permute.xlu0 %v1497_v1  ;;  %v1360_v3 = vld [vmem:[%s1760_s4] ss:$8 sps:$4 sm:$0xff]   ;;  %v1361_v4 = vld [vmem:[%s1760_s4 + $0x14] ss:$8 sps:$4 sm:$0xff]   ;;  %v1363_v5 = vld [vmem:[%s1760_s4 + $0x10] ss:$8 sps:$4 sm:$0xff]  }
  0x2c   :  { %1357 = vset.pattern.permute.xlu1 %v1497_v1  ;;  %138 = vmatprep.subr.bf16.mxu0 %v1358_v2  ;;  %v1364_v6 = vld [vmem:[%s1760_s4 + $0x24] ss:$8 sps:$4 sm:$0xff]   ;;  %v1366_v7 = vld [vmem:[%s1760_s4 + $0x20] ss:$8 sps:$4 sm:$0xff]   ;;  %v1367_v8 = vld [vmem:[%s1760_s4 + $0x34] ss:$8 sps:$4 sm:$0xff]  }
  0x2d   :  { %139 = vmatpush1.bf16.msra.mxu0 %v1360_v3  ;;  %v1369_v9 = vld [vmem:[%s1760_s4 + $0x30] ss:$8 sps:$4 sm:$0xff]   ;;  %v1370_v10 = vld [vmem:[#allocation3] sm:$0xff]   ;;  %v80_v12 = vshrl.u32 %v79_v11, 7  ;;  %vm1631_vm1 = vmpackc.low %vm134_vm0, %vm134_vm0  ;;  %vm289_vm2 = vcmask 130048   ;;  %vm1499_vm3 = vmmov 0  }
  0x2e   :  { %140 = vmatprep.subr.bf16.mxu0 %v1361_v4  ;;  %v77_v14 = vld [vmem:[%s1761_s5] sm:$0x3]  ;;  %v1664_v11 = vld [vmem:[#allocation6 + $0x8] sm:$0xff]  ;;  %vm1054_vm4 = vcmask 261120   ;;  %vm1078_vm5 = vcmask 7168   ;;  %vm1127_vm6 = vcmask 1041409  }
  0x2f   :  { %v81_v13 = vsub.s32 0, %v80_v12  ;;  %v85_v15 = vsub.s32 1, %v80_v12  ;;  %v769_v16 = vsub.s32 3, %v80_v12  ;;  %v183_v17 = vld [vmem:[%s1759_s3] sm:$0xf]  ;;  %v577_v18 = vsub.s32 2, %v80_v12 }
  0x30   :  { %v1666_v12 = vld [vmem:[#allocation6] sm:$0xff]  ;;  %vm1130_vm7 = vcmask 517120  }
  0x31   :  { %141 = vmatpush1.bf16.msra.mxu0 %v1363_v5  ;;  %v82_v19 = vrot.slane %v77_v14, %v81_v13  ;;  %v86_v20 = vrot.slane %v77_v14, %v85_v15  ;;  %v187_v21 = vrot.slane %v183_v17, %v81_v13  ;;  %v770_v22 = vrot.slane %v183_v17, %v769_v16 }
  0x32   :  { %142 = vmatprep.subr.bf16.mxu0 %v1364_v6  ;;  %v307_v23 = vrot.slane %v183_v17, %v85_v15  ;;  %v578_v25 = vrot.slane %v183_v17, %v577_v18 }
  0x35   :  { %143 = vmatpush1.bf16.msra.mxu0 %v1366_v7 }
  0x36   :  { %144 = vmatprep.subr.bf16.mxu0 %v1367_v8 }
  0x39   :  { %145 = vmatpush1.bf16.msra.mxu0 %v1369_v9 }
  0x3c   :  { %1157 = vmatmul.mubr.msk.bf16.vlgmr.msra.gmra.mrb[0].mxu0 %vm134_vm0, %v1370_v10 }
 0x10f   :  { %v172_v24 = vpop.f32.mrb[0].mxu0 }
 0x110   :  { %v173_v26 = vadd.f32 %v172_v24, %v82_v19  ;;  %v174_v27 = vpop.f32.mrb[1].mxu0 }
 0x111   :  { %v175_v28 = vadd.f32 %v174_v27, %v86_v20  ;;  %v176_v29 = vpop.f32.mrb[2].mxu0 }
 0x112   :  { %v177_v30 = vadd.f32 %v176_v29, %v82_v19  ;;  %v178_v31 = vpop.f32.mrb[3].mxu0  ;;  %v188_v32 = vmul.f32 %v187_v21, %v173_v26  ;;  %v771_v33 = vmul.f32 %v770_v22, %v173_v26  ;;  %v308_v34 = vmul.f32 %v307_v23, %v173_v26 }
 0x113   :  { %v179_v35 = vadd.f32 %v178_v31, %v86_v20  ;;  %v411_v36 = vmul.f32 %v307_v23, %v175_v28  ;;  %v302_v37 = vmul.f32 %v187_v21, %v175_v28  ;;  %v1616_v38 = vmul.f32 %v578_v25, %v173_v26 }
 0x114   :  { %1231 = vmatprep.mubr.msk.f32.mxu1 %vm134_vm0, %v188_v32  ;;  %1273 = vmatprep.mubr.msk.f32.mxu0 %vm134_vm0, %v771_v33  ;;  %v1351_v39 = vpack.i.bf16 %v177_v30, %v173_v26  ;;  %v189_v40 = vmul.f32 %v187_v21, %v177_v30  ;;  %v772_v41 = vmul.f32 %v770_v22, %v177_v30 }
 0x115   :  { %v412_v42 = vmul.f32 %v307_v23, %v179_v35  ;;  %v309_v43 = vmul.f32 %v307_v23, %v177_v30  ;;  %v303_v44 = vmul.f32 %v187_v21, %v179_v35  ;;  %v682_v45 = vmul.f32 %v578_v25, %v175_v28 }
 0x116   :  { %1352 = vrot.lane.b32.xlu0 %v1351_v39, %s1492_s24  ;;  %v683_v46 = vmul.f32 %v578_v25, %v179_v35  ;;  %v1621_v47 = vmul.f32 %v578_v25, %v177_v30  ;;  %v874_v48 = vmul.f32 %v770_v22, %v175_v28  ;;  %v875_v49 = vmul.f32 %v770_v22, %v179_v35 }
 0x117   :  { %v1307_v50 = vpack.c.bf16 %v412_v42, %v411_v36  ;;  %v1623_v51 = vpack.c.bf16 %v303_v44, %v302_v37 }
 0x118   :  { %v1625_v52 = vpack.c.bf16 %v683_v46, %v682_v45  ;;  %v1627_v53 = vpack.c.bf16 %v875_v49, %v874_v48 }
 0x188   :  { %v1353_v54 = vpop.permute.xlu0 %1352 }
 0x189   :  { %v1355_v55 = vunpack.i.h.bf16 %v1353_v54  ;;  %v1354_v56 = vunpack.i.l.bf16 %v1353_v54 }
 0x18b   :  { %v1635_v58 = vpack.c.bf16 %v1355_v55, %v1354_v56 }
 0x18d   :  { %1297 = vmatprep.subr.msk.bf16.mxu1 %vm1631_vm1, %v1635_v58  ;;  %1327 = vmatprep.subr.msk.bf16.mxu0 %vm1631_vm1, %v1635_v58 }
 0x18e   :  { %1300 = vmatpush3.bf16.xpose.msk.msra.mxu1 %vm1631_vm1, %v1635_v58  ;;  %1330 = vmatpush3.bf16.xpose.msk.msra.mxu0 %vm1631_vm1, %v1635_v58 }
 0x18f   :  { %1303 = vmatprep.subr.msk.bf16.mxu1 %vm1631_vm1, %v1635_v58 }
 0x195   :  { %1232 = vmatmul.mubr.msk.f32.vlgmr.msra.gmra.mrb[0].mxu1 %vm134_vm0, %v189_v40  ;;  %1274 = vmatmul.mubr.msk.f32.vlgmr.msra.gmra.mrb[4].mxu0 %vm134_vm0, %v772_v41 }
 0x196   :  { %1306 = vmatpush3.bf16.xpose.msk.msra.mxu1 %vm1631_vm1, %v1635_v58  ;;  %1238 = vmatprep.mubr.msk.f32.mxu1 %vm134_vm0, %v308_v34 }
 0x197   :  { %1308 = vmatprep.subr.bf16.mxu1 %v1307_v50 }
 0x19d   :  { %1239 = vmatmul.mubr.msk.f32.vlgmr.msra.gmra.mrb[2].mxu1 %vm134_vm0, %v309_v43 }
 0x19e   :  { %1310 = vmatpush3.bf16.msra.mxu1 %v1307_v50 }
 0x19f   :  { %1312 = vmatprep.subr.bf16.mxu1 %v1623_v51 }
 0x268   :  { %v1233_v59 = vpop.f32.mrb[0].mxu1  ;;  %v1660_v60 = vpop.f32.mrb[4].mxu0 }
 0x269   :  { %v272_v61 = vpop.f32.mrb[1].mxu1  ;;  %v1662_v62 = vpop.f32.mrb[5].mxu0  ;;  %v282_v2 = vmul.f32 0.25, %v1233_v59  ;;  %v855_v46 = vmul.f32 0.25, %v1660_v60 }
 0x26a   :  { %v281_v63 = vmul.f32 0.25, %v272_v61  ;;  %v854_v43 = vmul.f32 0.25, %v1662_v62  ;;  %v1371_v62 = vld [vmem:[%s1762_s6] sm:$0xff]  }
 0x26b   :  { %v285_v8 = vmul.f32 1.442695, %v282_v2  ;;  %v858_v49 = vmul.f32 1.442695, %v855_v46 }
 0x26c   :  { %v283_v0 = vmul.f32 1.442695, %v281_v63  ;;  %v856_v48 = vmul.f32 1.442695, %v854_v43  ;;  %v1498_v63 = vmov 0.0   ;;  %v1074_v43 = vld [vmem:[%s1758_s2] sm:$0xff] }
 0x26d   :  { %1283 = vmatprep.subr.bf16.mxu0 %v1498_v63  ;;  %1291 = vmatprep.mubr.msk.bf16.mxu0 %vm1499_vm3, %v1498_v63 }
 0x26e   :  { %1375 = vpow2.f32 %v283_v0  ;;  %1284 = vmatpush3.bf16.msra.mxu0 %v1371_v62  ;;  %v1372_v0 = vld [vmem:[%s1762_s6 + $0x8] sm:$0xff]  }
 0x26f   :  { %1285 = vmatprep.subr.bf16.mxu0 %v1498_v63 }
 0x270   :  { %v1240_v1 = vpop.f32.mrb[2].mxu1 }
 0x271   :  { %v392_v3 = vmul.f32 0.25, %v1240_v1  ;;  %v382_v4 = vpop.f32.mrb[3].mxu1  ;;  %v1373_v1 = vld [vmem:[%s1762_s6 + $0x10] sm:$0xff]  }
 0x272   :  { %v391_v5 = vmul.f32 0.25, %v382_v4  ;;  %1286 = vmatpush3.bf16.msra.mxu0 %v1372_v0 }
 0x273   :  { %v395_v6 = vmul.f32 1.442695, %v392_v3  ;;  %1287 = vmatprep.subr.bf16.mxu0 %v1498_v63 }
 0x274   :  { %v393_v7 = vmul.f32 1.442695, %v391_v5 }
 0x275   :  { %1377 = vpow2.f32 %v395_v6 }
 0x276   :  { %1379 = vpow2.f32 %v393_v7  ;;  %1288 = vmatpush3.bf16.msra.mxu0 %v1373_v1 }
 0x277   :  { %1381 = vpow2.f32 %v285_v8  ;;  %1289 = vmatprep.subr.bf16.mxu0 %v1498_v63 }
 0x278   :  { %v1376_v9 = vpop.eup %1375 }
 0x279   :  { %v287_v17 = vmul.f32 %v1376_v9, %v1666_v12 }
 0x27b   :  { %v290_v20 = vsel %vm289_vm2, %v287_v17, 0.0 }
 0x27f   :  { %v1378_v10 = vpop.eup %1377 }
 0x280   :  { %v1380_v13 = vpop.eup %1379  ;;  %v398_v14 = vmul.f32 %v1378_v10, %v1664_v11 }
 0x281   :  { %v397_v15 = vmul.f32 %v1380_v13, %v1666_v12  ;;  %v1382_v18 = vpop.eup %1381 }
 0x282   :  { %v402_v16 = vsel %vm289_vm2, %v398_v14, 0.0  ;;  %v288_v21 = vmul.f32 %v1382_v18, %v1664_v11  ;;  %v1374_v18 = vld [vmem:[%s1762_s6 + $0x18] sm:$0xff]  }
 0x283   :  { %403 = vadd.xlane.f32.xlu1 %v402_v16  ;;  %v399_v19 = vsel %vm289_vm2, %v397_v15, 0.0  ;;  %1290 = vmatpush3.bf16.msra.mxu0 %v1374_v18 }
 0x284   :  { %400 = vadd.xlane.f32.xlu0 %v399_v19  ;;  %v293_v22 = vsel %vm289_vm2, %v288_v21, 0.0 }
 0x287   :  { %291 = vadd.xlane.f32.xlu1 %v290_v20 }
 0x28b   :  { %294 = vadd.xlane.f32.xlu1 %v293_v22 }
 0x310   :  { %v404_v23 = vpop.xlane.xlu1 %403 }
 0x311   :  { %v406_v24 = vadd.f32 1e-08, %v404_v23  ;;  %v401_v25 = vpop.xlane.xlu0 %400 }
 0x312   :  { %v405_v26 = vadd.f32 1e-08, %v401_v25 }
 0x313   :  { %1383 = vrcp.f32 %v406_v24 }
 0x314   :  { %1385 = vrcp.f32 %v405_v26  ;;  %v292_v27 = vpop.xlane.xlu1 %291 }
 0x315   :  { %v296_v28 = vadd.f32 1e-08, %v292_v27 }
 0x317   :  { %1387 = vrcp.f32 %v296_v28  ;;  %v1188_v28 = vld [vmem:[%s1764_s8] ss:$0 sm:$0xff] }
 0x318   :  { %v295_v29 = vpop.xlane.xlu1 %294 }
 0x319   :  { %v297_v30 = vadd.f32 1e-08, %v295_v29 }
 0x31b   :  { %1389 = vrcp.f32 %v297_v30 }
 0x31d   :  { %v1384_v31 = vpop.eup %1383 }
 0x31e   :  { %v1386_v32 = vpop.eup %1385  ;;  %v410_v34 = vmul.f32 %v1384_v31, %v398_v14 }
 0x31f   :  { %v409_v33 = vmul.f32 %v1386_v32, %v397_v15 }
 0x321   :  { %v1388_v35 = vpop.eup %1387  ;;  %1245 = vmatprep.mubr.msk.f32.mxu1 %vm289_vm2, %v409_v33 }
 0x322   :  { %1246 = vmatmul.mubr.msk.f32.vlgmr.msra.gmra.mrb[4].mxu1 %vm289_vm2, %v410_v34  ;;  %v300_v36 = vmul.f32 %v1388_v35, %v287_v17  ;;  %v1189_v35 = vld [vmem:[#allocation2] ss:$0 sm:$0xff] }
 0x323   :  { %1314 = vmatpush3.bf16.msra.mxu1 %v1623_v51 }
 0x324   :  { %1317 = vmatprep.subr.msk.bf16.mxu1 %vm1631_vm1, %v1635_v58  ;;  %1252 = vmatprep.mubr.msk.f32.mxu1 %vm289_vm2, %v300_v36 }
 0x325   :  { %v1390_v37 = vpop.eup %1389 }
 0x326   :  { %v301_v39 = vmul.f32 %v1390_v37, %v288_v21  ;;  %v1182_v21 = vld [vmem:[%s1763_s7] ss:$0 sm:$0xff] }
 0x32a   :  { %1253 = vmatmul.mubr.msk.f32.vlgmr.msra.gmra.mrb[4].mxu1 %vm289_vm2, %v301_v39 }
 0x32b   :  { %1259 = vmatprep.mubr.msk.f32.mxu1 %vm134_vm0, %v1616_v38 }
 0x32c   :  { %1320 = vmatpush3.bf16.xpose.msk.msra.mxu1 %vm1631_vm1, %v1635_v58 }
 0x32d   :  { %1322 = vmatprep.subr.bf16.mxu1 %v1625_v52 }
 0x333   :  { %1260 = vmatmul.mubr.msk.f32.vlgmr.msra.gmra.mrb[6].mxu1 %vm134_vm0, %v1621_v47 }
 0x334   :  { %1324 = vmatpush3.bf16.msra.mxu1 %v1625_v52 }
 0x335   :  { %1332 = vmatprep.subr.bf16.mxu1 %v1627_v53 }
 0x406   :  { %v1261_v40 = vpop.f32.mrb[6].mxu1 }
 0x407   :  { %v663_v41 = vmul.f32 0.25, %v1261_v40  ;;  %v653_v42 = vpop.f32.mrb[7].mxu1 }
 0x408   :  { %v662_v44 = vmul.f32 0.25, %v653_v42 }
 0x409   :  { %v666_v38 = vmul.f32 1.442695, %v663_v41 }
 0x40a   :  { %v664_v45 = vmul.f32 1.442695, %v662_v44 }
 0x40b   :  { %1391 = vpow2.f32 %v666_v38 }
 0x40c   :  { %1393 = vpow2.f32 %v664_v45  ;;  %v1075_v45 = vld [vmem:[%s1758_s2 + $0x8] sm:$0xff]  ;;  %s1500_s2 = smov [#allocation8]  }
 0x40d   :  { %1395 = vpow2.f32 %v856_v48  ;;  %s1138_s27 = sshll.u32 %s1500_s2, 4  ;;  %s1139_s27 = int_to_ptr.vmem [resolvable:$true] %s1138_s27 }
 0x40e   :  { %1397 = vpow2.f32 %v858_v49  ;;  %s1463_s28 = scalar_lea.vmem %s1139_s27, 32  ;;  %p1468_p3 = scmp.lt.s32.totalorder %s1139_s27, %s1139_s27 }
 0x40f   :  { %p1464_p2 = scmp.ne.s32.totalorder %s1139_s27, %s1463_s28  ;;  %p1469_p4 = scmp.lt.s32.totalorder %s1463_s28, %s1463_s28 }
 0x411   :  { %p1470_p5 = por %p1469_p4, %p1468_p3 }
 0x413   :  { %p1471_p6 = pnand %p1470_p5, %p1464_p2 }
 0x415   :  { %v1392_v47 = vpop.eup %1391 }
 0x416   :  { %v1394_v50 = vpop.eup %1393  ;;  %v669_v54 = vmul.f32 %v1392_v47, %v1664_v11 }
 0x417   :  { %v668_v51 = vmul.f32 %v1394_v50, %v1666_v12  ;;  %v1396_v55 = vpop.eup %1395 }
 0x418   :  { %v673_v56 = vsel %vm289_vm2, %v669_v54, 0.0  ;;  %v860_v57 = vmul.f32 %v1396_v55, %v1666_v12  ;;  %v1398_v58 = vpop.eup %1397 }
 0x419   :  { %v670_v52 = vsel %vm289_vm2, %v668_v51, 0.0  ;;  %v861_v60 = vmul.f32 %v1398_v58, %v1664_v11 }
 0x41a   :  { %671 = vadd.xlane.f32.xlu1 %v670_v52  ;;  %v862_v59 = vsel %vm289_vm2, %v860_v57, 0.0 }
 0x41b   :  { %v865_v61 = vsel %vm289_vm2, %v861_v60, 0.0 }
 0x41e   :  { %674 = vadd.xlane.f32.xlu1 %v673_v56 }
 0x422   :  { %863 = vadd.xlane.f32.xlu1 %v862_v59 }
 0x426   :  { %866 = vadd.xlane.f32.xlu1 %v865_v61 }
 0x4a7   :  { %v672_v2 = vpop.xlane.xlu1 %671 }
 0x4a8   :  { %v676_v3 = vadd.f32 1e-08, %v672_v2 }
 0x4aa   :  { %1399 = vrcp.f32 %v676_v3 }
 0x4ab   :  { %v675_v4 = vpop.xlane.xlu1 %674 }
 0x4ac   :  { %v677_v5 = vadd.f32 1e-08, %v675_v4 }
 0x4ae   :  { %1401 = vrcp.f32 %v677_v5 }
 0x4af   :  { %v864_v6 = vpop.xlane.xlu1 %863 }
 0x4b0   :  { %v868_v7 = vadd.f32 1e-08, %v864_v6 }
 0x4b2   :  { %1403 = vrcp.f32 %v868_v7 }
 0x4b3   :  { %v867_v8 = vpop.xlane.xlu1 %866 }
 0x4b4   :  { %v1400_v9 = vpop.eup %1399  ;;  %v869_v10 = vadd.f32 1e-08, %v867_v8 }
 0x4b5   :  { %v680_v11 = vmul.f32 %v1400_v9, %v668_v51 }
 0x4b6   :  { %1405 = vrcp.f32 %v869_v10 }
 0x4b7   :  { %1266 = vmatprep.mubr.msk.f32.mxu1 %vm289_vm2, %v680_v11 }
 0x4b8   :  { %v1402_v12 = vpop.eup %1401 }
 0x4b9   :  { %v681_v13 = vmul.f32 %v1402_v12, %v669_v54 }
 0x4bb   :  { %1267 = vmatmul.mubr.msk.f32.vlgmr.msra.gmra.mrb[4].mxu1 %vm289_vm2, %v681_v13 }
 0x4bc   :  { %v1404_v14 = vpop.eup %1403  ;;  %1334 = vmatpush3.bf16.msra.mxu1 %v1627_v53 }
 0x4bd   :  { %v872_v15 = vmul.f32 %v1404_v14, %v860_v57 }
 0x4bf   :  { %1280 = vmatprep.mubr.msk.f32.mxu1 %vm289_vm2, %v872_v15 }
 0x4c0   :  { %v1406_v16 = vpop.eup %1405 }
 0x4c1   :  { %v873_v17 = vmul.f32 %v1406_v16, %v861_v60 }
 0x4c3   :  { %1281 = vmatmul.mubr.msk.f32.vlgmr.msra.gmra.mrb[4].mxu1 %vm289_vm2, %v873_v17 }
 0x596   :  { %v1721_v19 = vpop.f32.mrb[4].mxu1 }
 0x597   :  { %v1723_v20 = vpop.f32.mrb[5].mxu1 }
 0x598   :  { %v959_v53 = vpack.c.bf16 %v1721_v19, %v1723_v20 }
 0x59a   :  { %1292 = vmatmul.mubr.msk.bf16.vlgmr.msra.gmra.mrb[8].mxu0 %vm134_vm0, %v959_v53 }
 0x66d   :  { %v1036_v22 = vpop.f32.mrb[8].mxu0 }
 0x66e   :  { %v1037_v23 = vadd.f32 %v1182_v21, %v1036_v22  ;;  %v1293_v24 = vpop.f32.mrb[9].mxu0 }
 0x66f   :  { %v1039_v25 = vpop.f32.mrb[10].mxu0 }
 0x670   :  { %1407 = vtanh.f32 %v1037_v23  ;;  %v1040_v26 = vadd.f32 %v1182_v21, %v1039_v25  ;;  %v1294_v27 = vpop.f32.mrb[11].mxu0 }
 0x672   :  { %1409 = vtanh.f32 %v1040_v26 }
 0x67a   :  { %v1408_v29 = vpop.eup %1407 }
 0x67b   :  { %v1052_v30 = vmul.f32 %v1408_v29, %v1188_v28 }
 0x67c   :  { %v1410_v31 = vpop.eup %1409 }
 0x67d   :  { %v1055_v32 = vsel %vm1054_vm4, %v1052_v30, 0.0  ;;  %v1053_v33 = vmul.f32 %v1410_v31, %v1188_v28 }
 0x67e   :  { %1056 = vadd.xlane.f32.xlu1 %v1055_v32 }
 0x67f   :  { %v1058_v34 = vsel %vm1054_vm4, %v1053_v33, 0.0 }
 0x682   :  { %1059 = vadd.xlane.f32.xlu1 %v1058_v34 }
 0x70b   :  { %v1057_v36 = vpop.xlane.xlu1 %1056 }
 0x70c   :  { %v1068_v37 = vadd.f32 %v1189_v35, %v1057_v36 }
 0x70e   :  { %v1070_v39 = vmul.f32 1.442695, %v1068_v37 }
 0x70f   :  { %v1060_v40 = vpop.xlane.xlu1 %1059 }
 0x710   :  { %1411 = vpow2.f32 %v1070_v39  ;;  %v1069_v41 = vadd.f32 %v1189_v35, %v1060_v40 }
 0x712   :  { %v1072_v42 = vmul.f32 1.442695, %v1069_v41 }
 0x714   :  { %1413 = vpow2.f32 %v1072_v42 }
 0x71a   :  { %v1412_v44 = vpop.eup %1411 }
 0x71b   :  { %v1076_v38 = vmul.f32 %v1412_v44, %v1074_v43 }
 0x71d   :  { %v1079_v46 = vsel %vm1078_vm5, %v1076_v38, 0.0 }
 0x71e   :  { %v1414_v48 = vpop.eup %1413  ;;  %v1080_v49 = vrot.slane %v1079_v46, 4 }
 0x71f   :  { %v1077_v47 = vmul.f32 %v1414_v48, %v1075_v45 }
 0x720   :  { %v1081_v50 = vadd.f32 %v1080_v49, %v1079_v46 }
 0x721   :  { %v1086_v51 = vsel %vm1078_vm5, %v1077_v47, 0.0 }
 0x722   :  { %v1082_v52 = vrot.slane %v1081_v50, 2  ;;  %v1087_v54 = vrot.slane %v1086_v51, 4 }
 0x724   :  { %v1083_v55 = vadd.f32 %v1082_v52, %v1081_v50  ;;  %v1088_v56 = vadd.f32 %v1087_v54, %v1086_v51 }
 0x726   :  { %v1084_v57 = vrot.slane %v1083_v55, 1  ;;  %v1089_v58 = vrot.slane %v1088_v56, 2 }
 0x728   :  { %v1085_v59 = vadd.f32 %v1084_v57, %v1083_v55  ;;  %v1090_v60 = vadd.f32 %v1089_v58, %v1088_v56 }
 0x72a   :  { %v1093_v61 = vadd.f32 1e-08, %v1085_v59  ;;  %v1091_v62 = vrot.slane %v1090_v60, 1 }
 0x72c   :  { %1415 = vrcp.f32 %v1093_v61  ;;  %v1092_v63 = vadd.f32 %v1091_v62, %v1090_v60 }
 0x72e   :  { %v1094_v0 = vadd.f32 1e-08, %v1092_v63 }
 0x730   :  { %1417 = vrcp.f32 %v1094_v0 }
 0x736   :  { %v1416_v1 = vpop.eup %1415 }
 0x737   :  { %v1097_v2 = vmul.f32 %v1416_v1, %v1076_v38 }
 0x739   :  { %1101 = vperm.xlu0 %1356, %v1097_v2  }
 0x73a   :  { %v1418_v3 = vpop.eup %1417 }
 0x73b   :  { %v1098_v4 = vmul.f32 %v1418_v3, %v1077_v47 }
 0x73d   :  { %1106 = vperm.xlu1 %1357, %v1098_v4  }
 0x7b8   :  { %v1102_v5 = vpop.permute.xlu0 %1101 }
 0x7b9   :  { %v1109_v6 = vmul.f32 %v1102_v5, %v1723_v20 }
 0x7bb   :  { %v1111_v7 = vsel %vm134_vm0, %v1109_v6, 0.0 }
 0x7bc   :  { %v1112_v8 = vrot.slane %v1111_v7, 4  ;;  %v1107_v9 = vpop.permute.xlu1 %1106 }
 0x7bd   :  { %v1110_v10 = vmul.f32 %v1721_v19, %v1107_v9 }
 0x7be   :  { %v1113_v11 = vadd.f32 %v1112_v8, %v1111_v7 }
 0x7bf   :  { %v1118_v12 = vsel %vm134_vm0, %v1110_v10, 0.0 }
 0x7c0   :  { %v1114_v13 = vrot.slane %v1113_v11, 2  ;;  %v1119_v14 = vrot.slane %v1118_v12, 4 }
 0x7c2   :  { %v1115_v15 = vadd.f32 %v1114_v13, %v1113_v11  ;;  %v1120_v16 = vadd.f32 %v1119_v14, %v1118_v12 }
 0x7c4   :  { %v1121_v17 = vrot.slane %v1120_v16, 2  ;;  %v1116_v18 = vrot.slane %v1115_v15, 1 }
 0x7c6   :  { %v1122_v53 = vadd.f32 %v1121_v17, %v1120_v16  ;;  %v1117_v20 = vadd.f32 %v1116_v18, %v1115_v15 }
 0x7c8   :  { %v1123_v21 = vrot.slane %v1122_v53, 1 }
 0x7ca   :  { %v1124_v22 = vadd.f32 %v1123_v21, %v1122_v53 }
 0x7cc   :  { %v1128_v23 = vsel %vm1127_vm6, %v1124_v22, %v1117_v20 }
 0x7cd   :  { %1131 = vst.msk [vmem:[#allocation8] sm:$0x3] %vm1130_vm7, %v1128_v23 }
 0x7ce   :  { %1474 = shalt.err (!%p1471_p6)
}
 0x7cf   :  { %s1475_s11 = scalar_lea.hbm %s1766_s10, 32 }
 0x7d0   :  { %p1476_p7 = scmp.ne.s32.totalorder %s1766_s10, %s1475_s11  ;;  %p1479_p8 = scmp.lt.u32.totalorder %s1475_s11, %s1766_s10 }
 0x7d2   :  { %p1481_p9 = pnand %p1479_p8, %p1476_p7 }
 0x7d4   :  { %1484 = shalt.err (!%p1481_p9)
}
 0x7d5   :  { %1141 = dma.vmem_to_hbm [thread:$0]  %s1139_s27, 32, %s1766_s10, [#allocation5]  }
 0x7d6   :  { %1489 = dma.done.wait [#allocation5], 32  }
 0x7d7   :  { %1490 = vsyncadd [#allocation5], 4294967264 }
 0x7d8   :  { %1145 = vsyncpa [#allocation4], 1 }
 0x7d9   :  { %1146 = vsyncpa [#allocation7], 1 }
 0x7da   :  { %1147 = vsyncpa [#allocation5], 1 }

</bundles_post_ra>
